<compile_context>
chip_gen: v5e
topology: v5e:2x2
jax: 0.10.0
libtpu: 0.0.40
codegen_flags: <defaults>
</compile_context>

<pallas_src>
import functools

import jax
import jax.numpy as jnp
from jax.experimental import pallas as pl
from jax.experimental.pallas import tpu as pltpu

LEAKY_SLOPE = 0.2


def _round_up(x: int, m: int) -> int:
    return (x + m - 1) // m * m


def _vmem_capacity_bytes() -> int:
    """Per-core VMEM capacity; conservative 64 MiB (v7x) if the query fails."""
    try:
        info = pltpu.get_tpu_info()
        cap = int(getattr(info, "vmem_capacity_bytes", 0))
        if cap > 0:
            return cap
    except Exception:
        pass
    return 64 * 1024 * 1024


def _single_buffered(shape, index_map):
    """BlockSpec for a grid-invariant operand: DMA'd once, single VMEM buffer."""
    try:
        return pl.BlockSpec(shape, index_map, pipeline_mode=pl.Buffered(1))
    except Exception:  # older jax without pipeline_mode: fall back to default
        return pl.BlockSpec(shape, index_map)


def _pick_tiles(n, d, hp, in_itemsize, budget, use_gp):
    """Largest (batch_tile, feature_tile) whose VMEM footprint fits `budget`."""
    n_pad8 = max(8, _round_up(n, 8))
    d_pad = _round_up(d, 128)

    tb_cands = [c for c in (512, 256, 128, 64, 32, 16, 8) if c <= n_pad8] or [8]
    td_cands = [c for c in (4096, 2048, 1024, 512, 256, 128) if c <= d_pad] or [d_pad]

    def footprint(tb, td):
        nk = -(-d_pad // td)
        c = 2 * 2 * tb * td * in_itemsize                    # real+fake, 2 buffers
        c += (1 if nk == 1 else 2) * td * hp * in_itemsize   # w1 (resident if nk==1)
        if nk > 1:
            c += 2 * tb * hp * 4                             # layer-1 accumulator
        if tb < 128:
            c += 2 * tb * td * in_itemsize                   # fused-stream concat
        if use_gp:
            c += hp * hp * 4                                 # Gram (single buffer)
            c += 2 * tb * 128 * 4                            # mix block (lane pad)
        c += 4 * hp * 4 + 8 * 128 * 4                        # b1, w2 row, partials
        c += 2 * tb * hp * 4                                 # finalize temporaries
        c += 1 << 20                                         # slack
        return c

    for tb in tb_cands:
        for td in td_cands:
            if footprint(tb, td) <= budget:
                return tb, td
    return tb_cands[-1], td_cands[-1]


def _make_kernel(*, tb, nk, n_valid, rows_padded, use_gp, fuse_streams):
    """Build the Pallas kernel body (all flags / sizes are static)."""
    need_mask = rows_padded != n_valid

    def kernel(*refs):
        i = 0
        real_ref, fake_ref = refs[0], refs[1]
        i = 2
        mix_ref = None
        if use_gp:
            mix_ref = refs[i]
            i += 1
        w1_ref, b1_ref, w2r_ref = refs[i], refs[i + 1], refs[i + 2]
        i += 3
        g_ref = None
        if use_gp:
            g_ref = refs[i]
            i += 1
        out_ref = refs[i]
        i += 1
        pre_ref = refs[i] if nk > 1 else None

        b = pl.program_id(0)
        k = pl.program_id(1)

        w1t = w1_ref[...]                                    # (TD, Hp)

        # ---- layer-1 contribution of this (batch tile, feature tile) --------
        if fuse_streams:
            # small batch tile: pack real+fake rows into one MXU matmul
            x = jnp.concatenate([real_ref[...], fake_ref[...]], axis=0)
            contrib = jnp.dot(x, w1t, preferred_element_type=jnp.float32)
        else:
            # TB already fills the MXU M dim: two dots, no (2*TB, TD) concat copy
            contrib_r = jnp.dot(real_ref[...], w1t,
                                preferred_element_type=jnp.float32)
            contrib_f = jnp.dot(fake_ref[...], w1t,
                                preferred_element_type=jnp.float32)

        if nk > 1:
            @pl.when(k == 0)
            def _():
                pre_ref[...] = jnp.zeros_like(pre_ref)

            if fuse_streams:
                pre_ref[...] += contrib
            else:
                pre_ref[pl.ds(0, tb), :] += contrib_r
                pre_ref[pl.ds(tb, tb), :] += contrib_f

        # ---- finalize this batch tile (runs once per batch tile) ------------
        def finalize():
            if nk > 1:
                pre_all = pre_ref[...]
                pre_r = pre_all[0:tb, :]
                pre_f = pre_all[tb:2 * tb, :]
            elif fuse_streams:
                pre_r = contrib[0:tb, :]
                pre_f = contrib[tb:2 * tb, :]
            else:
                pre_r, pre_f = contrib_r, contrib_f

            b1v = b1_ref[...]                                # (1, Hp)
            w2r = w2r_ref[...]                               # (1, Hp)

            pre_r = pre_r + b1v
            pre_f = pre_f + b1v
            h_r = jnp.where(pre_r > 0, pre_r, LEAKY_SLOPE * pre_r)
            h_f = jnp.where(pre_f > 0, pre_f, LEAKY_SLOPE * pre_f)
            # width-1 layer-2 projection on the VPU/XLU (lane reduce), not a
            # width-1 MXU matmul.  b2 is folded back in analytically by the
            # wrapper (it cancels in mean(fake)-mean(real)).
            out_r = jnp.sum(h_r * w2r, axis=1, keepdims=True)        # (TB, 1)
            out_f = jnp.sum(h_f * w2r, axis=1, keepdims=True)

            if need_mask:
                row = jax.lax.broadcasted_iota(jnp.int32, (tb, 1), 0) + b * tb
                valid = (row < n_valid).astype(jnp.float32)
                out_r = out_r * valid
                out_f = out_f * valid

            s_real = jnp.sum(out_r)
            s_fake = jnp.sum(out_f)
            s_real2 = jnp.sum(out_r * out_r)

            if use_gp:
                t = mix_ref[...]                                     # (TB, 1)
                # Layer 1 is affine => preactivations of lerp(real, fake, t)
                # are exactly lerp(pre_real, pre_fake, t): no third MXU stream.
                pre_m = pre_r + t * (pre_f - pre_r)
                a = jnp.where(pre_m > 0, 1.0, LEAKY_SLOPE) * w2r     # (TB, Hp)
                # ||dD/dx||^2 = a (w1^T w1) a^T  -- Gram trick, no (N, D)
                # gradient intermediate.
                ag = jnp.dot(a, g_ref[...], preferred_element_type=jnp.float32)
                gsq = jnp.maximum(jnp.sum(ag * a, axis=1, keepdims=True), 0.0)
                pen = (jnp.sqrt(gsq) - 1.0) ** 2
                if need_mask:
                    pen = pen * valid
                s_gp = jnp.sum(pen)
            else:
                s_gp = jnp.float32(0.0)

            # lane-dense (1, 8, 128) partials block; lanes 0..3 of sublane 0:
            # [sum D(real), sum D(fake), sum D(real)^2, sum (||grad||-1)^2]
            lane = jax.lax.broadcasted_iota(jnp.int32, (1, 8, 128), 2)
            sub = jax.lax.broadcasted_iota(jnp.int32, (1, 8, 128), 1)
            vals = jnp.where(lane == 0, s_real,
                   jnp.where(lane == 1, s_fake,
                   jnp.where(lane == 2, s_real2,
                   jnp.where(lane == 3, s_gp, 0.0))))
            out_ref[...] = jnp.where(sub == 0, vals, 0.0).astype(jnp.float32)

        if nk > 1:
            @pl.when(k == nk - 1)
            def _():
                finalize()
        else:
            finalize()

    return kernel


@functools.partial(
    jax.jit,
    static_argnames=("drift", "use_gp", "reg_lambda", "stream_dtype",
                     "batch_tile", "feature_tile"))
def wgangp_acgan_loss(real_images, fake_images, params, mixing_factors=None,
                      alpha=0, *, drift=0.001, use_gp=False, reg_lambda=10.0,
                      stream_dtype=jnp.float32, batch_tile=None,
                      feature_tile=None):
    """Pallas implementation of WGANGP_ACGAN.forward.

    real_images / fake_images : (N, C, H, W) f32 (NCHW, like PyTorch)
    params                    : dict w1 (D,HID), b1 (1,HID), w2 (HID,1), b2 (1,1)
    mixing_factors            : (N, 1) f32 (only used when use_gp=True)
    stream_dtype              : dtype used to stream real/fake/w1 from HBM
                                (jnp.bfloat16 halves HBM traffic; accumulation
                                and finalize math stay f32).
    batch_tile / feature_tile : optional tile-size overrides (for testing).
    """
    del alpha  # TODO(synk): fade-in alpha depends on the external discriminator.

    n = real_images.shape[0]
    real = real_images.reshape(n, -1).astype(jnp.float32)
    fake = fake_images.reshape(n, -1).astype(jnp.float32)
    d = real.shape[1]

    w1 = params["w1"].astype(jnp.float32)
    b1 = params["b1"].reshape(1, -1).astype(jnp.float32)
    w2 = params["w2"].astype(jnp.float32)
    b2 = params["b2"].reshape(()).astype(jnp.float32)
    hid = w1.shape[1]

    # Lane-pad the hidden dim to a multiple of 128 (padded columns are zero).
    hp = max(128, _round_up(hid, 128))
    if hp != hid:
        w1 = jnp.pad(w1, ((0, 0), (0, hp - hid)))
        b1 = jnp.pad(b1, ((0, 0), (0, hp - hid)))
        w2 = jnp.pad(w2, ((0, hp - hid), (0, 0)))
    w2_row = w2.reshape(1, hp)

    # Generation-aware VMEM budget (v7x: 64 MiB physical, v5e/v6e: 128 MiB).
    in_itemsize = jnp.dtype(stream_dtype).itemsize
    vmem_limit = min(_vmem_capacity_bytes() * 3 // 4, 100 * 1024 * 1024)
    tb, td = _pick_tiles(n, d, hp, in_itemsize, budget=vmem_limit * 3 // 4,
                         use_gp=use_gp)
    if batch_tile is not None:
        tb = batch_tile
    if feature_tile is not None:
        td = feature_tile

    n_pad = _round_up(max(n, tb), tb)
    d_pad = _round_up(d, td)
    nb, nk = n_pad // tb, d_pad // td
    fuse_streams = tb < 128   # pack real+fake into the MXU M dim only when small

    if n_pad != n or d_pad != d:
        real = jnp.pad(real, ((0, n_pad - n), (0, d_pad - d)))
        fake = jnp.pad(fake, ((0, n_pad - n), (0, d_pad - d)))
    if d_pad != d:
        w1 = jnp.pad(w1, ((0, d_pad - d), (0, 0)))

    # Stream the big operands at the requested dtype; MXU accumulates in f32.
    real_s = real.astype(stream_dtype)
    fake_s = fake.astype(stream_dtype)
    w1_s = w1.astype(stream_dtype)

    args = [real_s, fake_s]
    in_specs = [
        pl.BlockSpec((tb, td), lambda b, k: (b, k)),
        pl.BlockSpec((tb, td), lambda b, k: (b, k)),
    ]
    if use_gp:
        if mixing_factors is None:
            raise ValueError("mixing_factors is required when use_gp=True")
        mix = mixing_factors.reshape(n, 1).astype(jnp.float32)
        if n_pad != n:
            mix = jnp.pad(mix, ((0, n_pad - n), (0, 0)))
        args.append(mix)
        in_specs.append(pl.BlockSpec((tb, 1), lambda b, k: (b, 0)))

    args.append(w1_s)
    if nk == 1:
        # w1 is resident for the whole call: single VMEM buffer, one DMA.
        in_specs.append(_single_buffered((td, hp), lambda b, k: (k, 0)))
    else:
        in_specs.append(pl.BlockSpec((td, hp), lambda b, k: (k, 0)))
    args.append(b1)
    in_specs.append(_single_buffered((1, hp), lambda b, k: (0, 0)))
    args.append(w2_row)
    in_specs.append(_single_buffered((1, hp), lambda b, k: (0, 0)))
    if use_gp:
        # Data-independent Gram matrix for the analytic gradient norm.
        gram = jnp.dot(w1.T, w1, preferred_element_type=jnp.float32,
                       precision=jax.lax.Precision.HIGHEST)
        args.append(gram)
        in_specs.append(_single_buffered((hp, hp), lambda b, k: (0, 0)))
        # TODO(synk): for hp >= 2048 the resident (hp, hp) Gram would exceed
        # v7x VMEM; stream it in (hp, 512) column blocks inside the finalize.

    scratch = [pltpu.VMEM((2 * tb, hp), jnp.float32)] if nk > 1 else []

    kernel = _make_kernel(tb=tb, nk=nk, n_valid=n, rows_padded=n_pad,
                          use_gp=use_gp, fuse_streams=fuse_streams)

    partials = pl.pallas_call(
        kernel,
        out_shape=jax.ShapeDtypeStruct((nb, 8, 128), jnp.float32),
        grid_spec=pltpu.PrefetchScalarGridSpec(
            num_scalar_prefetch=0,
            grid=(nb, nk),
            in_specs=in_specs,
            out_specs=pl.BlockSpec((1, 8, 128), lambda b, k: (b, 0, 0)),
            scratch_shapes=scratch,
        ),
        compiler_params=pltpu.CompilerParams(
            # batch tiles are independent -> megacore-shardable on v7x
            dimension_semantics=("parallel", "arbitrary"),
            vmem_limit_bytes=int(vmem_limit),
        ),
    )(*args)

    # Final (tiny) reduction + loss formula in plain JAX: keeps the batch axis
    # 'parallel' and avoids a single serially-updated SMEM accumulator.
    sums = jnp.sum(partials[:, 0, :], axis=0)
    s_real, s_fake, s_real2, s_gp = sums[0], sums[1], sums[2], sums[3]
    inv_n = jnp.float32(1.0 / n)
    loss = (s_fake - s_real) * inv_n
    if drift != 0.0:
        # Kernel D-outputs exclude b2; fold it back in analytically:
        # mean((s + b2)^2) = (sum s^2 + 2 b2 sum s)/n + b2^2
        loss = loss + drift * ((s_real2 + 2.0 * b2 * s_real) * inv_n + b2 * b2)
    if use_gp:
        loss = loss + reg_lambda * s_gp * inv_n
    return loss


def _reference_loss(real_images, fake_images, params, mixing_factors=None,
                    drift=0.001, use_gp=False, reg_lambda=10.0):
    """Pure-JAX reference (mirrors the PyTorch forward) for a sanity check."""
    n = real_images.shape[0]
    real = real_images.reshape(n, -1).astype(jnp.float32)
    fake = fake_images.reshape(n, -1).astype(jnp.float32)
    w1, b1, w2, b2 = (params[k].astype(jnp.float32)
                      for k in ("w1", "b1", "w2", "b2"))

    def disc(x):
        pre = x @ w1 + b1
        h = jnp.where(pre > 0, pre, LEAKY_SLOPE * pre)
        return h @ w2 + b2

    real_out = disc(real)
    fake_out = disc(fake)
    loss = fake_out.mean() - real_out.mean()
    if drift != 0.0:
        loss = loss + drift * jnp.mean(real_out ** 2)
    if use_gp:
        mix = mixing_factors.reshape(n, 1).astype(jnp.float32)
        mixed = real + mix * (fake - real)
        grad = jax.vmap(jax.grad(lambda x: disc(x[None, :])[0, 0]))(mixed)
        gnorm = jnp.linalg.norm(grad, axis=1)
        loss = loss + reg_lambda * jnp.mean((gnorm - 1.0) ** 2)
    return loss


if __name__ == "__main__":
    key = jax.random.PRNGKey(0)
    k_real, k_fake, k_w1, k_b1, k_w2, k_mix, k_extra = jax.random.split(key, 7)

    # Primary shapes implied by the module: batch=2, channels=4, spatial=16.
    N, C, H, W = 2, 4, 16, 16
    D = C * H * W          # 1024 flattened features
    HID = 32               # synthetic discriminator hidden width

    real_images = jax.random.normal(k_real, (N, C, H, W), jnp.float32)
    fake_images = jax.random.normal(k_fake, (N, C, H, W), jnp.float32)
    params = {
        "w1": jax.random.normal(k_w1, (D, HID), jnp.float32) * 0.05,
        "b1": jax.random.normal(k_b1, (1, HID), jnp.float32) * 0.01,
        "w2": jax.random.normal(k_w2, (HID, 1), jnp.float32) * 0.1,
        "b2": jnp.full((1, 1), 0.07, jnp.float32),
    }
    # torch.rand((N,1,1,1)) -> per-sample mixing scalar, flattened to (N, 1).
    mixing_factors = jax.random.uniform(k_mix, (N, 1), jnp.float32)

    # 1) default module config: drift=0.001, use_gp=False
    loss_plain = wgangp_acgan_loss(real_images, fake_images, params,
                                   mixing_factors, alpha=0,
                                   drift=0.001, use_gp=False)
    jax.block_until_ready(loss_plain)
    ref_plain = _reference_loss(real_images, fake_images, params,
                                mixing_factors, drift=0.001, use_gp=False)
    assert jnp.allclose(loss_plain, ref_plain, rtol=1e-3, atol=1e-3), \
        (loss_plain, ref_plain)

    # 2) gradient-penalty branch enabled
    loss_gp = wgangp_acgan_loss(real_images, fake_images, params,
                                mixing_factors, alpha=0,
                                drift=0.001, use_gp=True, reg_lambda=10.0)
    jax.block_until_ready(loss_gp)
    ref_gp = _reference_loss(real_images, fake_images, params, mixing_factors,
                             drift=0.001, use_gp=True, reg_lambda=10.0)
    assert jnp.allclose(loss_gp, ref_gp, rtol=1e-3, atol=1e-3), (loss_gp, ref_gp)

    # 3) bf16 streaming of real/fake/w1; checked against the reference run on
    #    the same bf16-rounded operands (f32 math otherwise).
    loss_bf16 = wgangp_acgan_loss(real_images, fake_images, params,
                                  mixing_factors, alpha=0, drift=0.001,
                                  use_gp=True, reg_lambda=10.0,
                                  stream_dtype=jnp.bfloat16)
    jax.block_until_ready(loss_bf16)

    def _rb(x):
        return x.astype(jnp.bfloat16).astype(jnp.float32)

    params_rb = dict(params, w1=_rb(params["w1"]))
    ref_bf16 = _reference_loss(_rb(real_images), _rb(fake_images), params_rb,
                               mixing_factors, drift=0.001, use_gp=True,
                               reg_lambda=10.0)
    assert jnp.allclose(loss_bf16, ref_bf16, rtol=3e-2, atol=3e-2), \
        (loss_bf16, ref_bf16)

    # 4) multi-D-tile accumulation + padded/masked batch rows (N=6 -> 8 rows)
    N2, C2, H2, W2 = 6, 4, 32, 32
    D2 = C2 * H2 * W2
    kk = jax.random.split(k_extra, 6)
    real2 = jax.random.normal(kk[0], (N2, C2, H2, W2), jnp.float32)
    fake2 = jax.random.normal(kk[1], (N2, C2, H2, W2), jnp.float32)
    params2 = {
        "w1": jax.random.normal(kk[2], (D2, HID), jnp.float32) * 0.03,
        "b1": jax.random.normal(kk[3], (1, HID), jnp.float32) * 0.01,
        "w2": jax.random.normal(kk[4], (HID, 1), jnp.float32) * 0.1,
        "b2": jnp.full((1, 1), -0.03, jnp.float32),
    }
    mix2 = jax.random.uniform(kk[5], (N2, 1), jnp.float32)
    loss_tiled = wgangp_acgan_loss(real2, fake2, params2, mix2, alpha=0,
                                   drift=0.001, use_gp=True, reg_lambda=10.0,
                                   feature_tile=1024)
    jax.block_until_ready(loss_tiled)
    ref_tiled = _reference_loss(real2, fake2, params2, mix2, drift=0.001,
                                use_gp=True, reg_lambda=10.0)
    assert jnp.allclose(loss_tiled, ref_tiled, rtol=1e-3, atol=1e-3), \
        (loss_tiled, ref_tiled)

    # 5) large batch tile -> un-fused two-dot path + D-tile accumulation
    N3 = 128
    kk3 = jax.random.split(kk[5], 3)
    real3 = jax.random.normal(kk3[0], (N3, C, H, W), jnp.float32)
    fake3 = jax.random.normal(kk3[1], (N3, C, H, W), jnp.float32)
    mix3 = jax.random.uniform(kk3[2], (N3, 1), jnp.float32)
    loss_big = wgangp_acgan_loss(real3, fake3, params, mix3, alpha=0,
                                 drift=0.001, use_gp=True, reg_lambda=10.0,
                                 feature_tile=512)
    jax.block_until_ready(loss_big)
    ref_big = _reference_loss(real3, fake3, params, mix3, drift=0.001,
                              use_gp=True, reg_lambda=10.0)
    assert jnp.allclose(loss_big, ref_big, rtol=1e-3, atol=1e-3), \
        (loss_big, ref_big)

    print("KERNEL_OK")
</pallas_src>

<mosaic_0001>
module attributes {stable_mosaic.version = 11 : i64} {
  func.func @kernel(%arg0: i32, %arg1: i32, %arg2: memref<8x1024xf32, #tpu.memory_space<vmem>>, %arg3: memref<8x1024xf32, #tpu.memory_space<vmem>>, %arg4: memref<1024x128xf32, #tpu.memory_space<vmem>>, %arg5: memref<1x128xf32, #tpu.memory_space<vmem>>, %arg6: memref<1x128xf32, #tpu.memory_space<vmem>>, %arg7: memref<1x8x128xf32, #tpu.memory_space<vmem>>) attributes {dimension_semantics = [#tpu.dimension_semantics<parallel>, #tpu.dimension_semantics<arbitrary>], iteration_bounds = array<i64: 1, 1>, scalar_prefetch = 0 : i64, scratch_operands = 0 : i64, tpu.core_type = #tpu.core_type<tc>, window_params = [{transform_indices = @transform_0, window_bounds = array<i64: 8, 1024>}, {transform_indices = @transform_1, window_bounds = array<i64: 8, 1024>}, {pipeline_mode = #tpu.pipeline_mode<synchronous>, transform_indices = @transform_2, window_bounds = array<i64: 1024, 128>}, {pipeline_mode = #tpu.pipeline_mode<synchronous>, transform_indices = @transform_3, window_bounds = array<i64: 1, 128>}, {pipeline_mode = #tpu.pipeline_mode<synchronous>, transform_indices = @transform_4, window_bounds = array<i64: 1, 128>}, {transform_indices = @transform_5, window_bounds = array<i64: 1, 8, 128>}]} {
    %c0 = arith.constant 0 : index
    %c0_0 = arith.constant 0 : index
    %0 = vector.load %arg4[%c0, %c0_0] : memref<1024x128xf32, #tpu.memory_space<vmem>>, vector<1024x128xf32>
    %c0_1 = arith.constant 0 : index
    %c0_2 = arith.constant 0 : index
    %1 = vector.load %arg2[%c0_1, %c0_2] : memref<8x1024xf32, #tpu.memory_space<vmem>>, vector<8x1024xf32>
    %c0_3 = arith.constant 0 : index
    %c0_4 = arith.constant 0 : index
    %2 = vector.load %arg3[%c0_3, %c0_4] : memref<8x1024xf32, #tpu.memory_space<vmem>>, vector<8x1024xf32>
    %3 = tpu.concatenate %1, %2 in 0 : vector<8x1024xf32>, vector<8x1024xf32> -> vector<16x1024xf32>
    %cst = arith.constant dense<0.000000e+00> : vector<16x128xf32>
    %4 = tpu.matmul %3, %0, %cst {dimension_numbers = #tpu.dot_dimension_numbers<[1], [0], [0], [1], [0, 0, 1, 1], [], []>} : vector<16x1024xf32>, vector<1024x128xf32>, vector<16x128xf32> -> vector<16x128xf32>
    %5 = vector.extract_strided_slice %4 {offsets = [0, 0], sizes = [8, 128], strides = [1, 1]} : vector<16x128xf32> to vector<8x128xf32>
    %6 = vector.extract_strided_slice %4 {offsets = [8, 0], sizes = [8, 128], strides = [1, 1]} : vector<16x128xf32> to vector<8x128xf32>
    %c0_5 = arith.constant 0 : index
    %c0_6 = arith.constant 0 : index
    %7 = vector.load %arg5[%c0_5, %c0_6] : memref<1x128xf32, #tpu.memory_space<vmem>>, vector<1x128xf32>
    %c0_7 = arith.constant 0 : index
    %c0_8 = arith.constant 0 : index
    %8 = vector.load %arg6[%c0_7, %c0_8] : memref<1x128xf32, #tpu.memory_space<vmem>>, vector<1x128xf32>
    %9 = vector.broadcast %7 : vector<1x128xf32> to vector<8x128xf32>
    %10 = arith.addf %5, %9 : vector<8x128xf32>
    %11 = vector.broadcast %7 : vector<1x128xf32> to vector<8x128xf32>
    %12 = arith.addf %6, %11 : vector<8x128xf32>
    %cst_9 = arith.constant 0.000000e+00 : f32
    %13 = vector.broadcast %cst_9 : f32 to vector<8x128xf32>
    %14 = arith.cmpf ogt, %10, %13 : vector<8x128xf32>
    %cst_10 = arith.constant 2.000000e-01 : f32
    %15 = vector.broadcast %cst_10 : f32 to vector<8x128xf32>
    %16 = arith.mulf %15, %10 : vector<8x128xf32>
    %17 = arith.select %14, %10, %16 : vector<8x128xi1>, vector<8x128xf32>
    %cst_11 = arith.constant 0.000000e+00 : f32
    %18 = vector.broadcast %cst_11 : f32 to vector<8x128xf32>
    %19 = arith.cmpf ogt, %12, %18 : vector<8x128xf32>
    %cst_12 = arith.constant 2.000000e-01 : f32
    %20 = vector.broadcast %cst_12 : f32 to vector<8x128xf32>
    %21 = arith.mulf %20, %12 : vector<8x128xf32>
    %22 = arith.select %19, %12, %21 : vector<8x128xi1>, vector<8x128xf32>
    %23 = vector.broadcast %8 : vector<1x128xf32> to vector<8x128xf32>
    %24 = arith.mulf %17, %23 : vector<8x128xf32>
    %cst_13 = arith.constant dense<0.000000e+00> : vector<8xf32>
    %25 = vector.multi_reduction <add>, %24, %cst_13 [1] : vector<8x128xf32> to vector<8xf32>
    %26 = vector.shape_cast %25 : vector<8xf32> to vector<8x1xf32>
    %27 = vector.broadcast %8 : vector<1x128xf32> to vector<8x128xf32>
    %28 = arith.mulf %22, %27 : vector<8x128xf32>
    %cst_14 = arith.constant dense<0.000000e+00> : vector<8xf32>
    %29 = vector.multi_reduction <add>, %28, %cst_14 [1] : vector<8x128xf32> to vector<8xf32>
    %30 = vector.shape_cast %29 : vector<8xf32> to vector<8x1xf32>
    %31 = tpu.iota {dimensions = array<i32: 0>} : vector<8x1xi32>
    %c8_i32 = arith.constant 8 : i32
    %32 = arith.muli %arg0, %c8_i32 : i32
    %33 = vector.broadcast %32 : i32 to vector<8x1xi32>
    %34 = arith.addi %31, %33 : vector<8x1xi32>
    %c2_i32 = arith.constant 2 : i32
    %35 = vector.broadcast %c2_i32 : i32 to vector<8x1xi32>
    %36 = arith.cmpi slt, %34, %35 : vector<8x1xi32>
    %37 = arith.extui %36 : vector<8x1xi1> to vector<8x1xi32>
    %38 = arith.sitofp %37 : vector<8x1xi32> to vector<8x1xf32>
    %39 = arith.mulf %26, %38 : vector<8x1xf32>
    %40 = arith.mulf %30, %38 : vector<8x1xf32>
    %41 = vector.shape_cast %39 : vector<8x1xf32> to vector<1x8x1xf32>
    %cst_15 = arith.constant dense<0.000000e+00> : vector<1xf32>
    %42 = vector.multi_reduction <add>, %41, %cst_15 [1, 2] : vector<1x8x1xf32> to vector<1xf32>
    %43 = vector.shape_cast %42 : vector<1xf32> to vector<1x1x1xf32>
    %44 = vector.extract %43[0, 0, 0] : f32 from vector<1x1x1xf32>
    %45 = vector.shape_cast %40 : vector<8x1xf32> to vector<1x8x1xf32>
    %cst_16 = arith.constant dense<0.000000e+00> : vector<1xf32>
    %46 = vector.multi_reduction <add>, %45, %cst_16 [1, 2] : vector<1x8x1xf32> to vector<1xf32>
    %47 = vector.shape_cast %46 : vector<1xf32> to vector<1x1x1xf32>
    %48 = vector.extract %47[0, 0, 0] : f32 from vector<1x1x1xf32>
    %49 = arith.mulf %39, %39 : vector<8x1xf32>
    %50 = vector.shape_cast %49 : vector<8x1xf32> to vector<1x8x1xf32>
    %cst_17 = arith.constant dense<0.000000e+00> : vector<1xf32>
    %51 = vector.multi_reduction <add>, %50, %cst_17 [1, 2] : vector<1x8x1xf32> to vector<1xf32>
    %52 = vector.shape_cast %51 : vector<1xf32> to vector<1x1x1xf32>
    %53 = vector.extract %52[0, 0, 0] : f32 from vector<1x1x1xf32>
    %54 = tpu.iota {dimensions = array<i32: 2>} : vector<1x8x128xi32>
    %55 = tpu.iota {dimensions = array<i32: 1>} : vector<1x8x128xi32>
    %c0_i32 = arith.constant 0 : i32
    %56 = vector.broadcast %c0_i32 : i32 to vector<1x8x128xi32>
    %57 = arith.cmpi eq, %54, %56 : vector<1x8x128xi32>
    %c1_i32 = arith.constant 1 : i32
    %58 = vector.broadcast %c1_i32 : i32 to vector<1x8x128xi32>
    %59 = arith.cmpi eq, %54, %58 : vector<1x8x128xi32>
    %c2_i32_18 = arith.constant 2 : i32
    %60 = vector.broadcast %c2_i32_18 : i32 to vector<1x8x128xi32>
    %61 = arith.cmpi eq, %54, %60 : vector<1x8x128xi32>
    %c3_i32 = arith.constant 3 : i32
    %62 = vector.broadcast %c3_i32 : i32 to vector<1x8x128xi32>
    %63 = arith.cmpi eq, %54, %62 : vector<1x8x128xi32>
    %cst_19 = arith.constant 0.000000e+00 : f32
    %cst_20 = arith.constant 0.000000e+00 : f32
    %64 = vector.broadcast %cst_19 : f32 to vector<1x8x128xf32>
    %65 = vector.broadcast %cst_20 : f32 to vector<1x8x128xf32>
    %66 = arith.select %63, %64, %65 : vector<1x8x128xi1>, vector<1x8x128xf32>
    %67 = vector.broadcast %53 : f32 to vector<1x8x128xf32>
    %68 = arith.select %61, %67, %66 : vector<1x8x128xi1>, vector<1x8x128xf32>
    %69 = vector.broadcast %48 : f32 to vector<1x8x128xf32>
    %70 = arith.select %59, %69, %68 : vector<1x8x128xi1>, vector<1x8x128xf32>
    %71 = vector.broadcast %44 : f32 to vector<1x8x128xf32>
    %72 = arith.select %57, %71, %70 : vector<1x8x128xi1>, vector<1x8x128xf32>
    %c0_i32_21 = arith.constant 0 : i32
    %73 = vector.broadcast %c0_i32_21 : i32 to vector<1x8x128xi32>
    %74 = arith.cmpi eq, %55, %73 : vector<1x8x128xi32>
    %cst_22 = arith.constant 0.000000e+00 : f32
    %75 = vector.broadcast %cst_22 : f32 to vector<1x8x128xf32>
    %76 = arith.select %74, %72, %75 : vector<1x8x128xi1>, vector<1x8x128xf32>
    %c0_23 = arith.constant 0 : index
    %c0_24 = arith.constant 0 : index
    %c0_25 = arith.constant 0 : index
    %77 = vector.load %arg7[%c0_23, %c0_24, %c0_25] : memref<1x8x128xf32, #tpu.memory_space<vmem>>, vector<1x8x128xf32>
    tpu.vector_store %arg7[%c0_23, %c0_24, %c0_25], %76 {strides = array<i32>} : memref<1x8x128xf32, #tpu.memory_space<vmem>>, vector<1x8x128xf32>,
    return
  }
  func.func @transform_0(%arg0: i32, %arg1: i32) -> (i32, i32) {
    %c0_i32 = arith.constant 0 : i32
    return %arg0, %arg1 : i32, i32
  }
  func.func @transform_1(%arg0: i32, %arg1: i32) -> (i32, i32) {
    %c0_i32 = arith.constant 0 : i32
    return %arg0, %arg1 : i32, i32
  }
  func.func @transform_2(%arg0: i32, %arg1: i32) -> (i32, i32) {
    %c0_i32 = arith.constant 0 : i32
    %c0_i32_0 = arith.constant 0 : i32
    return %arg1, %c0_i32 : i32, i32
  }
  func.func @transform_3(%arg0: i32, %arg1: i32) -> (i32, i32) {
    %c0_i32 = arith.constant 0 : i32
    %c0_i32_0 = arith.constant 0 : i32
    %c0_i32_1 = arith.constant 0 : i32
    return %c0_i32, %c0_i32_0 : i32, i32
  }
  func.func @transform_4(%arg0: i32, %arg1: i32) -> (i32, i32) {
    %c0_i32 = arith.constant 0 : i32
    %c0_i32_0 = arith.constant 0 : i32
    %c0_i32_1 = arith.constant 0 : i32
    return %c0_i32, %c0_i32_0 : i32, i32
  }
  func.func @transform_5(%arg0: i32, %arg1: i32) -> (i32, i32, i32) {
    %c0_i32 = arith.constant 0 : i32
    %c0_i32_0 = arith.constant 0 : i32
    %c0_i32_1 = arith.constant 0 : i32
    return %arg0, %c0_i32, %c0_i32_0 : i32, i32, i32
  }
}

</mosaic_0001>

<bundles_post_ra>
// kernel: wgangp_acgan_loss.1
= control target key start
LH: loop header
LB: loop body
LE: loop exit
PB: predicated region body
PF: predicated region fallthrough
CT: control target
= control target key end

     0   :  { %vm380_vm3 = vcmask 7168   ;;  %s912_s2 = inlined_call_operand.vmem [shape: f32[1024,128], index: 2, kind: input, shape index: {}]   ;;  %s913_s0 = inlined_call_operand.vmem [shape: f32[8,1024], index: 0, kind: input, shape index: {}]   ;;  %s914_s1 = inlined_call_operand.vmem [shape: f32[8,1024], index: 1, kind: input, shape index: {}]   ;;  %s915_s3 = inlined_call_operand.vmem [shape: f32[1,128], index: 3, kind: input, shape index: {}]   ;;  %s916_s4 = inlined_call_operand.vmem [shape: f32[1,128], index: 4, kind: input, shape index: {}]   ;;  %s917_s5 = inlined_call_operand.vmem [shape: f32[1,8,128], index: 5, kind: output, shape index: {}]  }
   0x1   :  { %v35_v0 = vld [vmem:[%s912_s2 + $0x78] sm:$0xff]  ;;  %v34_v2 = vld [vmem:[%s912_s2 + $0x70] sm:$0xff]  ;;  %v33_v6 = vld [vmem:[%s912_s2 + $0x68] sm:$0xff] }
   0x2   :  { %v67_v1 = vld [vmem:[%s912_s2 + $0x178] sm:$0xff]  ;;  %164 = vmatpush.msra.mxu0 %v35_v0  ;;  %v66_v4 = vld [vmem:[%s912_s2 + $0x170] sm:$0xff]  ;;  %v65_v8 = vld [vmem:[%s912_s2 + $0x168] sm:$0xff] }
   0x3   :  { %210 = vmatpush.msra.mxu2 %v67_v1  ;;  %v51_v3 = vld [vmem:[%s912_s2 + $0xf8] sm:$0xff]  ;;  %v50_v7 = vld [vmem:[%s912_s2 + $0xf0] sm:$0xff]  ;;  %v49_v10 = vld [vmem:[%s912_s2 + $0xe8] sm:$0xff] }
   0x4   :  { %v83_v5 = vld [vmem:[%s912_s2 + $0x1f8] sm:$0xff]  ;;  %187 = vmatpush.msra.mxu1 %v51_v3  ;;  %165 = vmatpush.msra.mxu0 %v34_v2  ;;  %v82_v9 = vld [vmem:[%s912_s2 + $0x1f0] sm:$0xff]  ;;  %v32_v11 = vld [vmem:[%s912_s2 + $0x60] sm:$0xff] }
   0x5   :  { %233 = vmatpush.msra.mxu3 %v83_v5  ;;  %211 = vmatpush.msra.mxu2 %v66_v4  ;;  %v64_v12 = vld [vmem:[%s912_s2 + $0x160] sm:$0xff]  ;;  %v81_v13 = vld [vmem:[%s912_s2 + $0x1e8] sm:$0xff]  ;;  %v31_v16 = vld [vmem:[%s912_s2 + $0x58] sm:$0xff] }
   0x6   :  { %188 = vmatpush.msra.mxu1 %v50_v7  ;;  %166 = vmatpush.msra.mxu0 %v33_v6  ;;  %v48_v14 = vld [vmem:[%s912_s2 + $0xe0] sm:$0xff]  ;;  %v63_v17 = vld [vmem:[%s912_s2 + $0x158] sm:$0xff]  ;;  %v30_v20 = vld [vmem:[%s912_s2 + $0x50] sm:$0xff] }
   0x7   :  { %234 = vmatpush.msra.mxu3 %v82_v9  ;;  %212 = vmatpush.msra.mxu2 %v65_v8  ;;  %v80_v15 = vld [vmem:[%s912_s2 + $0x1e0] sm:$0xff]  ;;  %v47_v18 = vld [vmem:[%s912_s2 + $0xd8] sm:$0xff]  ;;  %v62_v21 = vld [vmem:[%s912_s2 + $0x150] sm:$0xff] }
   0x8   :  { %189 = vmatpush.msra.mxu1 %v49_v10  ;;  %167 = vmatpush.msra.mxu0 %v32_v11  ;;  %v79_v19 = vld [vmem:[%s912_s2 + $0x1d8] sm:$0xff]  ;;  %v46_v22 = vld [vmem:[%s912_s2 + $0xd0] sm:$0xff]  ;;  %v29_v24 = vld [vmem:[%s912_s2 + $0x48] sm:$0xff] }
   0x9   :  { %235 = vmatpush.msra.mxu3 %v81_v13  ;;  %213 = vmatpush.msra.mxu2 %v64_v12  ;;  %v78_v23 = vld [vmem:[%s912_s2 + $0x1d0] sm:$0xff]  ;;  %v61_v25 = vld [vmem:[%s912_s2 + $0x148] sm:$0xff]  ;;  %v28_v28 = vld [vmem:[%s912_s2 + $0x40] sm:$0xff] }
   0xa   :  { %190 = vmatpush.msra.mxu1 %v48_v14  ;;  %168 = vmatpush.msra.mxu0 %v31_v16  ;;  %v45_v26 = vld [vmem:[%s912_s2 + $0xc8] sm:$0xff]  ;;  %v60_v29 = vld [vmem:[%s912_s2 + $0x140] sm:$0xff]  ;;  %v27_v32 = vld [vmem:[%s912_s2 + $0x38] sm:$0xff] }
   0xb   :  { %236 = vmatpush.msra.mxu3 %v80_v15  ;;  %214 = vmatpush.msra.mxu2 %v63_v17  ;;  %v77_v27 = vld [vmem:[%s912_s2 + $0x1c8] sm:$0xff]  ;;  %v44_v30 = vld [vmem:[%s912_s2 + $0xc0] sm:$0xff]  ;;  %v59_v33 = vld [vmem:[%s912_s2 + $0x138] sm:$0xff] }
   0xc   :  { %191 = vmatpush.msra.mxu1 %v47_v18  ;;  %169 = vmatpush.msra.mxu0 %v30_v20  ;;  %v76_v31 = vld [vmem:[%s912_s2 + $0x1c0] sm:$0xff]  ;;  %v43_v34 = vld [vmem:[%s912_s2 + $0xb8] sm:$0xff]  ;;  %v26_v36 = vld [vmem:[%s912_s2 + $0x30] sm:$0xff] }
   0xd   :  { %237 = vmatpush.msra.mxu3 %v79_v19  ;;  %215 = vmatpush.msra.mxu2 %v62_v21  ;;  %v75_v35 = vld [vmem:[%s912_s2 + $0x1b8] sm:$0xff]  ;;  %v58_v37 = vld [vmem:[%s912_s2 + $0x130] sm:$0xff]  ;;  %v25_v40 = vld [vmem:[%s912_s2 + $0x28] sm:$0xff] }
   0xe   :  { %192 = vmatpush.msra.mxu1 %v46_v22  ;;  %170 = vmatpush.msra.mxu0 %v29_v24  ;;  %v42_v38 = vld [vmem:[%s912_s2 + $0xb0] sm:$0xff]  ;;  %v57_v41 = vld [vmem:[%s912_s2 + $0x128] sm:$0xff]  ;;  %v24_v44 = vld [vmem:[%s912_s2 + $0x20] sm:$0xff] }
   0xf   :  { %238 = vmatpush.msra.mxu3 %v78_v23  ;;  %216 = vmatpush.msra.mxu2 %v61_v25  ;;  %v74_v39 = vld [vmem:[%s912_s2 + $0x1b0] sm:$0xff]  ;;  %v41_v42 = vld [vmem:[%s912_s2 + $0xa8] sm:$0xff]  ;;  %v56_v45 = vld [vmem:[%s912_s2 + $0x120] sm:$0xff] }
  0x10   :  { %193 = vmatpush.msra.mxu1 %v45_v26  ;;  %171 = vmatpush.msra.mxu0 %v28_v28  ;;  %v73_v43 = vld [vmem:[%s912_s2 + $0x1a8] sm:$0xff]  ;;  %v40_v46 = vld [vmem:[%s912_s2 + $0xa0] sm:$0xff]  ;;  %v23_v48 = vld [vmem:[%s912_s2 + $0x18] sm:$0xff] }
  0x11   :  { %239 = vmatpush.msra.mxu3 %v77_v27  ;;  %217 = vmatpush.msra.mxu2 %v60_v29  ;;  %v72_v47 = vld [vmem:[%s912_s2 + $0x1a0] sm:$0xff]  ;;  %v55_v49 = vld [vmem:[%s912_s2 + $0x118] sm:$0xff]  ;;  %v22_v52 = vld [vmem:[%s912_s2 + $0x10] sm:$0xff] }
  0x12   :  { %194 = vmatpush.msra.mxu1 %v44_v30  ;;  %172 = vmatpush.msra.mxu0 %v27_v32  ;;  %v39_v50 = vld [vmem:[%s912_s2 + $0x98] sm:$0xff]  ;;  %v54_v53 = vld [vmem:[%s912_s2 + $0x110] sm:$0xff]  ;;  %v21_v56 = vld [vmem:[%s912_s2 + $0x8] sm:$0xff] }
  0x13   :  { %240 = vmatpush.msra.mxu3 %v76_v31  ;;  %218 = vmatpush.msra.mxu2 %v59_v33  ;;  %v71_v51 = vld [vmem:[%s912_s2 + $0x198] sm:$0xff]  ;;  %v38_v54 = vld [vmem:[%s912_s2 + $0x90] sm:$0xff]  ;;  %v53_v57 = vld [vmem:[%s912_s2 + $0x108] sm:$0xff] }
  0x14   :  { %195 = vmatpush.msra.mxu1 %v43_v34  ;;  %173 = vmatpush.msra.mxu0 %v26_v36  ;;  %v70_v55 = vld [vmem:[%s912_s2 + $0x190] sm:$0xff]  ;;  %v37_v58 = vld [vmem:[%s912_s2 + $0x88] sm:$0xff]  ;;  %v20_v60 = vld [vmem:[%s912_s2] sm:$0xff] }
  0x15   :  { %241 = vmatpush.msra.mxu3 %v75_v35  ;;  %219 = vmatpush.msra.mxu2 %v58_v37  ;;  %v69_v59 = vld [vmem:[%s912_s2 + $0x188] sm:$0xff]  ;;  %v52_v61 = vld [vmem:[%s912_s2 + $0x100] sm:$0xff]  ;;  %v99_v62 = vld [vmem:[%s912_s2 + $0x278] sm:$0xff] }
  0x16   :  { %196 = vmatpush.msra.mxu1 %v42_v38  ;;  %174 = vmatpush.msra.mxu0 %v25_v40  ;;  %v131_v63 = vld [vmem:[%s912_s2 + $0x378] sm:$0xff]  ;;  %v36_v0 = vld [vmem:[%s912_s2 + $0x80] sm:$0xff]  ;;  %v98_v2 = vld [vmem:[%s912_s2 + $0x270] sm:$0xff] }
  0x17   :  { %242 = vmatpush.msra.mxu3 %v74_v39  ;;  %220 = vmatpush.msra.mxu2 %v57_v41  ;;  %v68_v1 = vld [vmem:[%s912_s2 + $0x180] sm:$0xff]  ;;  %v115_v3 = vld [vmem:[%s912_s2 + $0x2f8] sm:$0xff]  ;;  %v130_v4 = vld [vmem:[%s912_s2 + $0x370] sm:$0xff] }
  0x18   :  { %197 = vmatpush.msra.mxu1 %v41_v42  ;;  %175 = vmatpush.msra.mxu0 %v24_v44  ;;  %v147_v5 = vld [vmem:[%s912_s2 + $0x3f8] sm:$0xff]  ;;  %v97_v6 = vld [vmem:[%s912_s2 + $0x268] sm:$0xff]  ;;  %v114_v7 = vld [vmem:[%s912_s2 + $0x2f0] sm:$0xff] }
  0x19   :  { %243 = vmatpush.msra.mxu3 %v73_v43  ;;  %221 = vmatpush.msra.mxu2 %v56_v45  ;;  %v129_v8 = vld [vmem:[%s912_s2 + $0x368] sm:$0xff]  ;;  %v146_v9 = vld [vmem:[%s912_s2 + $0x3f0] sm:$0xff]  ;;  %v96_v10 = vld [vmem:[%s912_s2 + $0x260] sm:$0xff] }
  0x1a   :  { %198 = vmatpush.msra.mxu1 %v40_v46  ;;  %176 = vmatpush.msra.mxu0 %v23_v48  ;;  %v113_v11 = vld [vmem:[%s912_s2 + $0x2e8] sm:$0xff]  ;;  %v128_v12 = vld [vmem:[%s912_s2 + $0x360] sm:$0xff]  ;;  %v95_v14 = vld [vmem:[%s912_s2 + $0x258] sm:$0xff] }
  0x1b   :  { %244 = vmatpush.msra.mxu3 %v72_v47  ;;  %222 = vmatpush.msra.mxu2 %v55_v49  ;;  %v145_v13 = vld [vmem:[%s912_s2 + $0x3e8] sm:$0xff]  ;;  %v112_v15 = vld [vmem:[%s912_s2 + $0x2e0] sm:$0xff]  ;;  %v127_v16 = vld [vmem:[%s912_s2 + $0x358] sm:$0xff] }
  0x1c   :  { %199 = vmatpush.msra.mxu1 %v39_v50  ;;  %177 = vmatpush.msra.mxu0 %v22_v52  ;;  %v144_v17 = vld [vmem:[%s912_s2 + $0x3e0] sm:$0xff]  ;;  %v94_v18 = vld [vmem:[%s912_s2 + $0x250] sm:$0xff]  ;;  %v111_v19 = vld [vmem:[%s912_s2 + $0x2d8] sm:$0xff] }
  0x1d   :  { %245 = vmatpush.msra.mxu3 %v71_v51  ;;  %223 = vmatpush.msra.mxu2 %v54_v53  ;;  %v126_v20 = vld [vmem:[%s912_s2 + $0x350] sm:$0xff]  ;;  %v143_v21 = vld [vmem:[%s912_s2 + $0x3d8] sm:$0xff]  ;;  %v93_v22 = vld [vmem:[%s912_s2 + $0x248] sm:$0xff] }
  0x1e   :  { %200 = vmatpush.msra.mxu1 %v38_v54  ;;  %178 = vmatpush.msra.mxu0 %v21_v56  ;;  %v110_v23 = vld [vmem:[%s912_s2 + $0x2d0] sm:$0xff]  ;;  %v125_v24 = vld [vmem:[%s912_s2 + $0x348] sm:$0xff]  ;;  %v92_v27 = vld [vmem:[%s912_s2 + $0x240] sm:$0xff] }
  0x1f   :  { %246 = vmatpush.msra.mxu3 %v70_v55  ;;  %224 = vmatpush.msra.mxu2 %v53_v57  ;;  %v142_v25 = vld [vmem:[%s912_s2 + $0x3d0] sm:$0xff]  ;;  %v109_v28 = vld [vmem:[%s912_s2 + $0x2c8] sm:$0xff]  ;;  %v124_v29 = vld [vmem:[%s912_s2 + $0x340] sm:$0xff] }
  0x20   :  { %201 = vmatpush.msra.mxu1 %v37_v58  ;;  %179 = vmatpush.msra.mxu0 %v20_v60  ;;  %v150_v26 = vld [vmem:[%s913_s0 + $0x10] sm:$0xff]  ;;  %v141_v30 = vld [vmem:[%s912_s2 + $0x3c8] sm:$0xff]  ;;  %v148_v31 = vld [vmem:[%s913_s0] sm:$0xff] }
  0x21   :  { %247 = vmatpush.msra.mxu3 %v69_v59  ;;  %225 = vmatpush.msra.mxu2 %v52_v61  ;;  %v151_v32 = vld [vmem:[%s913_s0 + $0x18] sm:$0xff]  ;;  %v108_v34 = vld [vmem:[%s912_s2 + $0x2c0] sm:$0xff]  ;;  %v149_v37 = vld [vmem:[%s913_s0 + $0x8] sm:$0xff] }
  0x22   :  { %256 = vmatpush.msrb.mxu0 %v99_v62  ;;  %202 = vmatpush.msra.mxu1 %v36_v0  ;;  %v91_v33 = vld [vmem:[%s912_s2 + $0x238] sm:$0xff]  ;;  %v140_v36 = vld [vmem:[%s912_s2 + $0x3c0] sm:$0xff]  ;;  %v90_v38 = vld [vmem:[%s912_s2 + $0x230] sm:$0xff] }
  0x23   :  { %302 = vmatpush.msrb.mxu2 %v131_v63  ;;  %248 = vmatpush.msra.mxu3 %v68_v1  ;;  %v123_v35 = vld [vmem:[%s912_s2 + $0x338] sm:$0xff]  ;;  %v122_v40 = vld [vmem:[%s912_s2 + $0x330] sm:$0xff]  ;;  %v89_v42 = vld [vmem:[%s912_s2 + $0x228] sm:$0xff] }
  0x24   :  { %257 = vmatpush.msrb.mxu0 %v98_v2  ;;  %279 = vmatpush.msrb.mxu1 %v115_v3  ;;  %v107_v39 = vld [vmem:[%s912_s2 + $0x2b8] sm:$0xff]  ;;  %v106_v43 = vld [vmem:[%s912_s2 + $0x2b0] sm:$0xff]  ;;  %v121_v44 = vld [vmem:[%s912_s2 + $0x328] sm:$0xff] }
  0x25   :  { %303 = vmatpush.msrb.mxu2 %v130_v4  ;;  %325 = vmatpush.msrb.mxu3 %v147_v5  ;;  %v139_v41 = vld [vmem:[%s912_s2 + $0x3b8] sm:$0xff]  ;;  %v138_v45 = vld [vmem:[%s912_s2 + $0x3b0] sm:$0xff]  ;;  %v88_v47 = vld [vmem:[%s912_s2 + $0x220] sm:$0xff] }
  0x26   :  { %258 = vmatpush.msrb.mxu0 %v97_v6  ;;  %280 = vmatpush.msrb.mxu1 %v114_v7  ;;  %v158_v46 = vld [vmem:[%s914_s1 + $0x10] sm:$0xff]  ;;  %v105_v48 = vld [vmem:[%s912_s2 + $0x2a8] sm:$0xff]  ;;  %v120_v49 = vld [vmem:[%s912_s2 + $0x320] sm:$0xff] }
  0x27   :  { %304 = vmatpush.msrb.mxu2 %v129_v8  ;;  %326 = vmatpush.msrb.mxu3 %v146_v9  ;;  %v137_v50 = vld [vmem:[%s912_s2 + $0x3a8] sm:$0xff]  ;;  %v156_v51 = vld [vmem:[%s914_s1] sm:$0xff]  ;;  %v159_v52 = vld [vmem:[%s914_s1 + $0x18] sm:$0xff] }
  0x28   :  { %259 = vmatpush.msrb.mxu0 %v96_v10  ;;  %281 = vmatpush.msrb.mxu1 %v113_v11  ;;  %v87_v53 = vld [vmem:[%s912_s2 + $0x218] sm:$0xff]  ;;  %v104_v54 = vld [vmem:[%s912_s2 + $0x2a0] sm:$0xff]  ;;  %v157_v57 = vld [vmem:[%s914_s1 + $0x8] sm:$0xff] }
  0x29   :  { %305 = vmatpush.msrb.mxu2 %v128_v12  ;;  %327 = vmatpush.msrb.mxu3 %v145_v13  ;;  %v119_v55 = vld [vmem:[%s912_s2 + $0x318] sm:$0xff]  ;;  %v136_v56 = vld [vmem:[%s912_s2 + $0x3a0] sm:$0xff]  ;;  %v86_v58 = vld [vmem:[%s912_s2 + $0x210] sm:$0xff] }
  0x2a   :  { %260 = vmatpush.msrb.mxu0 %v95_v14  ;;  %282 = vmatpush.msrb.mxu1 %v112_v15  ;;  %v103_v59 = vld [vmem:[%s912_s2 + $0x298] sm:$0xff]  ;;  %v118_v60 = vld [vmem:[%s912_s2 + $0x310] sm:$0xff]  ;;  %v85_v62 = vld [vmem:[%s912_s2 + $0x208] sm:$0xff] }
  0x2b   :  { %306 = vmatpush.msrb.mxu2 %v127_v16  ;;  %328 = vmatpush.msrb.mxu3 %v144_v17  ;;  %v135_v61 = vld [vmem:[%s912_s2 + $0x398] sm:$0xff]  ;;  %v102_v63 = vld [vmem:[%s912_s2 + $0x290] sm:$0xff]  ;;  %v117_v0 = vld [vmem:[%s912_s2 + $0x308] sm:$0xff] }
  0x2c   :  { %261 = vmatpush.msrb.mxu0 %v94_v18  ;;  %283 = vmatpush.msrb.mxu1 %v111_v19  ;;  %v134_v1 = vld [vmem:[%s912_s2 + $0x390] sm:$0xff]  ;;  %v84_v2 = vld [vmem:[%s912_s2 + $0x200] sm:$0xff]  ;;  %v101_v3 = vld [vmem:[%s912_s2 + $0x288] sm:$0xff] }
  0x2d   :  { %307 = vmatpush.msrb.mxu2 %v126_v20  ;;  %329 = vmatpush.msrb.mxu3 %v143_v21  ;;  %v116_v4 = vld [vmem:[%s912_s2 + $0x300] sm:$0xff]  ;;  %v133_v5 = vld [vmem:[%s912_s2 + $0x388] sm:$0xff]  ;;  %v154_v7 = vld [vmem:[%s913_s0 + $0x30] sm:$0xff] }
  0x2e   :  { %262 = vmatpush.msrb.mxu0 %v93_v22  ;;  %284 = vmatpush.msrb.mxu1 %v110_v23  ;;  %v152_v6 = vld [vmem:[%s913_s0 + $0x20] sm:$0xff]  ;;  %v153_v10 = vld [vmem:[%s913_s0 + $0x28] sm:$0xff]  ;;  %v155_v11 = vld [vmem:[%s913_s0 + $0x38] sm:$0xff] }
  0x2f   :  { %308 = vmatpush.msrb.mxu2 %v125_v24  ;;  %330 = vmatpush.msrb.mxu3 %v142_v25  ;;  %v100_v8 = vld [vmem:[%s912_s2 + $0x280] sm:$0xff]  ;;  %v162_v13 = vld [vmem:[%s914_s1 + $0x30] sm:$0xff]  ;;  %v161_v14 = vld [vmem:[%s914_s1 + $0x28] sm:$0xff] }
  0x30   :  { %226 = vmatmul.f32.vlgmr.msra.gmra.mxu2 %v150_v26  ;;  %263 = vmatpush.msrb.mxu0 %v92_v27  ;;  %v132_v9 = vld [vmem:[%s912_s2 + $0x380] sm:$0xff]  ;;  %v163_v15 = vld [vmem:[%s914_s1 + $0x38] sm:$0xff] }
  0x31   :  { %285 = vmatpush.msrb.mxu1 %v109_v28  ;;  %309 = vmatpush.msrb.mxu2 %v124_v29  ;;  %v160_v12 = vld [vmem:[%s914_s1 + $0x20] sm:$0xff] }
  0x32   :  { %331 = vmatpush.msrb.mxu3 %v141_v30  ;;  %180 = vmatmul.f32.vlgmr.msra.gmra.mxu0 %v148_v31 }
  0x33   :  { %249 = vmatmul.f32.vlgmr.msra.gmra.mxu3 %v151_v32  ;;  %264 = vmatpush.msrb.mxu0 %v91_v33 }
  0x34   :  { %286 = vmatpush.msrb.mxu1 %v108_v34  ;;  %310 = vmatpush.msrb.mxu2 %v123_v35 }
  0x35   :  { %332 = vmatpush.msrb.mxu3 %v140_v36  ;;  %203 = vmatmul.f32.vlgmr.msra.gmra.mxu1 %v149_v37  ;;  %v438_v36 = vld [vmem:[%s915_s3] ss:$0 sm:$0xff] }
  0x36   :  { %265 = vmatpush.msrb.mxu0 %v90_v38  ;;  %287 = vmatpush.msrb.mxu1 %v107_v39 }
  0x37   :  { %311 = vmatpush.msrb.mxu2 %v122_v40  ;;  %333 = vmatpush.msrb.mxu3 %v139_v41 }
  0x38   :  { %266 = vmatpush.msrb.mxu0 %v89_v42  ;;  %288 = vmatpush.msrb.mxu1 %v106_v43  ;;  %v439_v43 = vld [vmem:[%s916_s4] ss:$0 sm:$0xff] }
  0x39   :  { %312 = vmatpush.msrb.mxu2 %v121_v44  ;;  %334 = vmatpush.msrb.mxu3 %v138_v45 }
  0x3a   :  { %229 = vmatmul.f32.gmra.mxu2 %v158_v46  ;;  %267 = vmatpush.msrb.mxu0 %v88_v47 }
  0x3b   :  { %289 = vmatpush.msrb.mxu1 %v105_v48  ;;  %313 = vmatpush.msrb.mxu2 %v120_v49 }
  0x3c   :  { %335 = vmatpush.msrb.mxu3 %v137_v50  ;;  %183 = vmatmul.f32.gmra.mxu0 %v156_v51 }
  0x3d   :  { %252 = vmatmul.f32.gmra.mxu3 %v159_v52  ;;  %268 = vmatpush.msrb.mxu0 %v87_v53 }
  0x3e   :  { %290 = vmatpush.msrb.mxu1 %v104_v54  ;;  %314 = vmatpush.msrb.mxu2 %v119_v55 }
  0x3f   :  { %336 = vmatpush.msrb.mxu3 %v136_v56  ;;  %206 = vmatmul.f32.gmra.mxu1 %v157_v57  ;;  %v370_v56 = vlaneseq }
  0x40   :  { %269 = vmatpush.msrb.mxu0 %v86_v58  ;;  %291 = vmatpush.msrb.mxu1 %v103_v59  ;;  %v440_v58 = vmov 0.0  }
  0x41   :  { %315 = vmatpush.msrb.mxu2 %v118_v60  ;;  %337 = vmatpush.msrb.mxu3 %v135_v61  ;;  %v371_v57 = vshrl.u32 %v370_v56, 7 }
  0x42   :  { %270 = vmatpush.msrb.mxu0 %v85_v62  ;;  %292 = vmatpush.msrb.mxu1 %v102_v63 }
  0x43   :  { %316 = vmatpush.msrb.mxu2 %v117_v0  ;;  %338 = vmatpush.msrb.mxu3 %v134_v1  ;;  %vm375_vm2 = vcmp.lt.s32.totalorder %v371_v57, 2  ;;  %vm423_vm7 = vcmp.eq.s32.totalorder %v371_v57, 0 }
  0x44   :  { %271 = vmatpush.msrb.mxu0 %v84_v2  ;;  %293 = vmatpush.msrb.mxu1 %v101_v3  ;;  %v430_v59 = vsel %vm375_vm2, 1.0, %v440_v58 }
  0x45   :  { %317 = vmatpush.msrb.mxu2 %v116_v4  ;;  %339 = vmatpush.msrb.mxu3 %v133_v5 }
  0x46   :  { %272 = vmatmul.f32.vlgmr.msrb.gmra.mxu0 %v152_v6  ;;  %318 = vmatmul.f32.vlgmr.msrb.gmra.mxu2 %v154_v7 }
  0x47   :  { %294 = vmatpush.msrb.mxu1 %v100_v8  ;;  %340 = vmatpush.msrb.mxu3 %v132_v9 }
  0x48   :  { %295 = vmatmul.f32.vlgmr.msrb.gmra.mxu1 %v153_v10  ;;  %341 = vmatmul.f32.vlgmr.msrb.gmra.mxu3 %v155_v11 }
  0x4e   :  { %275 = vmatmul.f32.gmra.mxu0 %v160_v12  ;;  %321 = vmatmul.f32.gmra.mxu2 %v162_v13 }
  0x50   :  { %298 = vmatmul.f32.gmra.mxu1 %v161_v14  ;;  %344 = vmatmul.f32.gmra.mxu3 %v163_v15 }
  0xaf   :  { %v181_v16 = vpop.f32.mrf.mxu0 }
  0xb2   :  { %v204_v17 = vpop.f32.mrf.mxu1 }
  0xb3   :  { %v227_v18 = vpop.f32.mrf.mxu2  ;;  %v205_v21 = vadd.f32 %v204_v17, %v181_v16 }
  0xb5   :  { %v228_v23 = vadd.f32 %v227_v18, %v205_v21 }
  0xb6   :  { %v250_v19 = vpop.f32.mrf.mxu3 }
  0xb7   :  { %v251_v25 = vadd.f32 %v250_v19, %v228_v23 }
  0xb9   :  { %v184_v20 = vpop.f32.mrf.mxu0 }
  0xbc   :  { %v207_v22 = vpop.f32.mrf.mxu1 }
  0xbd   :  { %v230_v24 = vpop.f32.mrf.mxu2  ;;  %v208_v26 = vadd.f32 %v207_v22, %v184_v20 }
  0xbf   :  { %v231_v31 = vadd.f32 %v230_v24, %v208_v26 }
  0xc0   :  { %v253_v27 = vpop.f32.mrf.mxu3 }
  0xc1   :  { %v254_v34 = vadd.f32 %v253_v27, %v231_v31 }
  0xc3   :  { %v273_v28 = vpop.f32.mrf.mxu0 }
  0xc4   :  { %v274_v29 = vadd.f32 %v273_v28, %v251_v25  ;;  %v413_v25 = vand.u32 127, %v370_v56 }
  0xc5   :  { %v296_v30 = vpop.f32.mrf.mxu1 }
  0xc6   :  { %v297_v32 = vadd.f32 %v296_v30, %v274_v29  ;;  %vm416_vm4 = vcmp.eq.s32.totalorder %v413_v25, 2  ;;  %vm415_vm5 = vcmp.eq.s32.totalorder %v413_v25, 1  ;;  %vm414_vm6 = vcmp.eq.s32.totalorder %v413_v25, 0 }
  0xc9   :  { %v319_v33 = vpop.f32.mrf.mxu2 }
  0xca   :  { %v320_v35 = vadd.f32 %v319_v33, %v297_v32 }
  0xcb   :  { %v276_v37 = vpop.f32.mrf.mxu0  ;;  %v342_v38 = vpop.f32.mrf.mxu3 }
  0xcc   :  { %v277_v39 = vadd.f32 %v276_v37, %v254_v34  ;;  %v343_v40 = vadd.f32 %v342_v38, %v320_v35 }
  0xcd   :  { %v299_v41 = vpop.f32.mrf.mxu1 }
  0xce   :  { %v353_v42 = vadd.f32 %v438_v36, %v343_v40  ;;  %v300_v44 = vadd.f32 %v299_v41, %v277_v39 }
  0xd0   :  { %vm355_vm0 = vcmp.gt.f32.partialorder %v353_v42, 0.0  ;;  %v356_v45 = vmul.f32 0.2, %v353_v42 }
  0xd1   :  { %v322_v46 = vpop.f32.mrf.mxu2 }
  0xd2   :  { %v323_v47 = vadd.f32 %v322_v46, %v300_v44  ;;  %v357_v48 = vsel %vm355_vm0, %v353_v42, %v356_v45 }
  0xd3   :  { %v345_v49 = vpop.f32.mrf.mxu3  ;;  %v364_v50 = vmul.f32 %v439_v43, %v357_v48 }
  0xd4   :  { %v346_v51 = vadd.f32 %v345_v49, %v323_v47 }
  0xd5   :  { %365 = vadd.xlane.f32.xlu0 %v364_v50 }
  0xd6   :  { %v354_v52 = vadd.f32 %v438_v36, %v346_v51 }
  0xd8   :  { %vm358_vm1 = vcmp.gt.f32.partialorder %v354_v52, 0.0  ;;  %v359_v53 = vmul.f32 0.2, %v354_v52 }
  0xda   :  { %v360_v54 = vsel %vm358_vm1, %v354_v52, %v359_v53 }
  0xdb   :  { %v367_v55 = vmul.f32 %v439_v43, %v360_v54 }
  0xdd   :  { %368 = vadd.xlane.f32.xlu0 %v367_v55 }
 0x148   :  { %v366_v60 = vpop.xlane.xlu0 %365 }
 0x149   :  { %v378_v61 = vmul.f32 %v430_v59, %v366_v60 }
 0x14b   :  { %v381_v62 = vsel %vm380_vm3, %v378_v61, 0.0  ;;  %v401_v63 = vmul.f32 %v378_v61, %v378_v61 }
 0x14c   :  { %382 = vadd.xlane.f32.xlu1 %v381_v62 }
 0x14d   :  { %v402_v0 = vsel %vm380_vm3, %v401_v63, 0.0 }
 0x14e   :  { %403 = vadd.xlane.f32.xlu2 %v402_v0 }
 0x150   :  { %v369_v1 = vpop.xlane.xlu0 %368 }
 0x151   :  { %v379_v2 = vmul.f32 %v430_v59, %v369_v1 }
 0x153   :  { %v391_v3 = vsel %vm380_vm3, %v379_v2, 0.0 }
 0x154   :  { %392 = vadd.xlane.f32.xlu1 %v391_v3 }
 0x1bf   :  { %v383_v4 = vpop.xlane.xlu1 %382 }
 0x1c0   :  { %v384_v5 = vrot.slane %v383_v4, 4 }
 0x1c1   :  { %v404_v6 = vpop.xlane.xlu2 %403 }
 0x1c2   :  { %v385_v7 = vadd.f32 %v384_v5, %v383_v4  ;;  %v405_v8 = vrot.slane %v404_v6, 4 }
 0x1c4   :  { %v386_v9 = vrot.slane %v385_v7, 2  ;;  %v406_v10 = vadd.f32 %v405_v8, %v404_v6 }
 0x1c6   :  { %v387_v11 = vadd.f32 %v386_v9, %v385_v7  ;;  %v407_v12 = vrot.slane %v406_v10, 2 }
 0x1c7   :  { %v393_v13 = vpop.xlane.xlu1 %392 }
 0x1c8   :  { %v394_v14 = vrot.slane %v393_v13, 4  ;;  %v388_v15 = vrot.slane %v387_v11, 1  ;;  %v408_v18 = vadd.f32 %v407_v12, %v406_v10 }
 0x1ca   :  { %v395_v16 = vadd.f32 %v394_v14, %v393_v13  ;;  %v389_v17 = vadd.f32 %v388_v15, %v387_v11  ;;  %v409_v21 = vrot.slane %v408_v18, 1 }
 0x1cc   :  { %v396_v19 = vrot.slane %v395_v16, 2  ;;  %431 = vpush %v389_v17  ;;  %v410_v24 = vadd.f32 %v409_v21, %v408_v18 }
 0x1ce   :  { %v397_v20 = vadd.f32 %v396_v19, %v395_v16 }
 0x1d0   :  { %v398_v22 = vrot.slane %v397_v20, 1 }
 0x1d2   :  { %v399_v23 = vadd.f32 %v398_v22, %v397_v20 }
 0x1d4   :  { %433 = vpush %v399_v23 }
 0x1d5   :  { %435 = vpush %v410_v24 }
 0x1fd   :  { %s432_s3 = spop %431 }
 0x1fe   :  { %v421_v29 = vstv %s432_s3 }
 0x205   :  { %s434_s4 = spop %433 }
 0x206   :  { %v419_v26 = vstv %s434_s4  ;;  %s436_s7 = spop %435 }
 0x207   :  { %v417_v27 = vstv %s436_s7 }
 0x208   :  { %v418_v28 = vsel %vm416_vm4, %v417_v27, 0.0 }
 0x209   :  { %v420_v30 = vsel %vm415_vm5, %v419_v26, %v418_v28 }
 0x20a   :  { %v422_v31 = vsel %vm414_vm6, %v421_v29, %v420_v30 }
 0x20b   :  { %v424_v32 = vsel %vm423_vm7, %v422_v31, 0.0 }
 0x20c   :  { %425 = vst [vmem:[%s917_s5] sm:$0xff] %v424_v32 }

</bundles_post_ra>
